<compile_context>
chip_gen: v6e
topology: v6e:2x2x1
jax: 0.10.0
libtpu: 0.0.40
codegen_flags: <defaults>
</compile_context>

<pallas_src>
import jax
import jax.numpy as jnp
from jax.experimental import pallas as pl
from jax.experimental.pallas import tpu as pltpu

NUM_USERS = 162541 + 1
NUM_ITEMS = 59047 + 1
RANK = 32          # args.rank
CHUNK = 512        # batch rows processed per grid step


def mf_kernel(u_idx_ref, s_idx_ref,        # SMEM (scalar prefetch): (B_pad,) int32 each
              u_tbl_ref, v_tbl_ref,        # HBM (pl.ANY): (NUM_USERS, R), (NUM_ITEMS, R)
              o_ref,                       # VMEM out block: (CHUNK, 1) f32
              u_buf, v_buf,                # VMEM scratch: (CHUNK, R) f32
              sems):                       # DMA semaphores: (2,)
    chunk = u_buf.shape[0]
    base = pl.program_id(0) * chunk

    # Phase 1: issue every row-gather DMA for this chunk (2*chunk copies of
    # rank*4 = 128 B each).  All copies are in flight concurrently, so the
    # per-row HBM latency is overlapped across the whole chunk.
    def issue(i, carry):
        u = u_idx_ref[base + i]
        s = s_idx_ref[base + i]
        pltpu.make_async_copy(u_tbl_ref.at[u], u_buf.at[i], sems.at[0]).start()
        pltpu.make_async_copy(v_tbl_ref.at[s], v_buf.at[i], sems.at[1]).start()
        return carry

    jax.lax.fori_loop(0, chunk, issue, 0)

    # Phase 2: drain — one wait per issued copy (all copies have equal size, so
    # the 2*chunk waits only complete once every gather has landed).
    def drain(i, carry):
        pltpu.make_async_copy(u_tbl_ref.at[0], u_buf.at[i], sems.at[0]).wait()
        pltpu.make_async_copy(v_tbl_ref.at[0], v_buf.at[i], sems.at[1]).wait()
        return carry

    jax.lax.fori_loop(0, chunk, drain, 0)

    # Phase 3: vectorized dot products over the full (chunk, rank) tiles:
    # VPU elementwise multiply + exact-f32 XLU lane reduction.
    prod = u_buf[...] * v_buf[...]
    o_ref[...] = jnp.sum(prod, axis=-1, keepdims=True)


def mf_forward(user_idx, serv_idx, user_table, item_table, *, chunk=CHUNK):
    """Pallas equivalent of MF.forward.

    user_idx, serv_idx : int (B,)
    user_table         : f32 (NUM_USERS, rank)
    item_table         : f32 (NUM_ITEMS, rank)
    returns            : f32 (B,)
    """
    B = user_idx.shape[0]
    n_users, rank = user_table.shape
    n_items = item_table.shape[0]

    # Shrink the chunk for tiny batches (stay a multiple of 8x128 tiling).
    chunk = min(chunk, max(128, int(pl.next_power_of_2(B))))

    # Clamp indices: the in-kernel gather DMAs index HBM directly.
    u_idx = jnp.clip(user_idx.astype(jnp.int32), 0, n_users - 1)
    s_idx = jnp.clip(serv_idx.astype(jnp.int32), 0, n_items - 1)

    # Pad the batch to a whole number of chunks so every grid step is identical
    # (padded slots gather row 0 and are sliced off below).
    num_chunks = pl.cdiv(B, chunk)
    b_pad = num_chunks * chunk
    if b_pad != B:
        u_idx = jnp.pad(u_idx, (0, b_pad - B))
        s_idx = jnp.pad(s_idx, (0, b_pad - B))

    grid_spec = pltpu.PrefetchScalarGridSpec(
        num_scalar_prefetch=2,                    # u_idx, s_idx live in SMEM
        grid=(num_chunks,),
        in_specs=[
            pl.BlockSpec(memory_space=pl.ANY),    # user table stays in HBM
            pl.BlockSpec(memory_space=pl.ANY),    # item table stays in HBM
        ],
        out_specs=pl.BlockSpec((chunk, 1), lambda c, u, s: (c, 0)),
        scratch_shapes=[
            pltpu.VMEM((chunk, rank), jnp.float32),
            pltpu.VMEM((chunk, rank), jnp.float32),
            pltpu.SemaphoreType.DMA((2,)),
        ],
    )

    out = pl.pallas_call(
        mf_kernel,
        out_shape=jax.ShapeDtypeStruct((b_pad, 1), jnp.float32),
        grid_spec=grid_spec,
        compiler_params=pltpu.CompilerParams(
            # Chunks are fully independent -> shard across both TCs on v7x;
            # harmless on single-core v5e/v6e.
            dimension_semantics=("parallel",)),
    )(u_idx, s_idx, user_table, item_table)

    return out[:B, 0]


if __name__ == "__main__":
    key = jax.random.PRNGKey(0)
    k_user, k_item, k_uidx, k_sidx = jax.random.split(key, 4)

    # nn.Embedding default init: N(0, 1).
    user_table = jax.random.normal(k_user, (NUM_USERS, RANK), dtype=jnp.float32)
    item_table = jax.random.normal(k_item, (NUM_ITEMS, RANK), dtype=jnp.float32)

    B = 1000   # not a multiple of CHUNK -> exercises padding (2 chunks of 512)
    user_idx = jax.random.randint(k_uidx, (B,), 0, NUM_USERS, dtype=jnp.int32)
    serv_idx = jax.random.randint(k_sidx, (B,), 0, NUM_ITEMS, dtype=jnp.int32)

    pred = jax.block_until_ready(
        mf_forward(user_idx, serv_idx, user_table, item_table))

    # Pure-JAX reference check.
    ref = jnp.sum(user_table[user_idx] * item_table[serv_idx], axis=-1)
    assert pred.shape == (B,)
    assert jnp.allclose(pred, ref, rtol=1e-4, atol=1e-4), (pred, ref)

    print("KERNEL_OK")
</pallas_src>

<mosaic_0001>
module attributes {stable_mosaic.version = 11 : i64} {
  func.func @mf_kernel(%arg0: i32, %arg1: memref<1024xi32, #tpu.memory_space<smem>>, %arg2: memref<1024xi32, #tpu.memory_space<smem>>, %arg3: memref<162542x32xf32, #tpu.memory_space<any>>, %arg4: memref<59048x32xf32, #tpu.memory_space<any>>, %arg5: memref<512x1xf32, #tpu.memory_space<vmem>>, %arg6: memref<512x32xf32, #tpu.memory_space<vmem>>, %arg7: memref<512x32xf32, #tpu.memory_space<vmem>>, %arg8: memref<2x!tpu.dma_semaphore, #tpu.memory_space<semaphore_mem>>) attributes {dimension_semantics = [#tpu.dimension_semantics<parallel>], iteration_bounds = array<i64: 2>, scalar_prefetch = 2 : i64, scratch_operands = 3 : i64, tpu.core_type = #tpu.core_type<tc>, window_params = [{}, {}, {transform_indices = @transform_2, window_bounds = array<i64: 512, 1>}]} {
    %c512_i32 = arith.constant 512 : i32
    %0 = arith.muli %arg0, %c512_i32 : i32
    %c0_i32 = arith.constant 0 : i32
    %c512_i32_0 = arith.constant 512 : i32
    %1 = arith.addi %c0_i32, %c512_i32_0 : i32
    %c1_i32 = arith.constant 1 : i32
    scf.for %arg9 = %c0_i32 to %1 step %c1_i32  : i32 {
      %9 = arith.addi %0, %arg9 : i32
      %10 = arith.index_cast %9 : i32 to index
      %11 = memref.load %arg1[%10] : memref<1024xi32, #tpu.memory_space<smem>>
      %12 = arith.addi %0, %arg9 : i32
      %13 = arith.index_cast %12 : i32 to index
      %14 = memref.load %arg2[%13] : memref<1024xi32, #tpu.memory_space<smem>>
      %c0_i32_11 = arith.constant 0 : i32
      %c0_i32_12 = arith.constant 0 : i32
      %15 = tpu.memref_slice %arg3[%11, %c0_i32_12] : memref<162542x32xf32, #tpu.memory_space<any>> -> memref<1x32xf32, #tpu.memory_space<any>>
      %16 = tpu.memref_squeeze %15 : memref<1x32xf32, #tpu.memory_space<any>> -> memref<32xf32, #tpu.memory_space<any>>
      %c0_i32_13 = arith.constant 0 : i32
      %17 = tpu.memref_slice %arg6[%arg9, %c0_i32_13] : memref<512x32xf32, #tpu.memory_space<vmem>> -> memref<1x32xf32, #tpu.memory_space<vmem>>
      %18 = tpu.memref_squeeze %17 : memref<1x32xf32, #tpu.memory_space<vmem>> -> memref<32xf32, #tpu.memory_space<vmem>>
      %19 = tpu.memref_slice %arg8[%c0_i32_11] : memref<2x!tpu.dma_semaphore, #tpu.memory_space<semaphore_mem>> -> memref<1x!tpu.dma_semaphore, #tpu.memory_space<semaphore_mem>>
      %20 = tpu.memref_squeeze %19 : memref<1x!tpu.dma_semaphore, #tpu.memory_space<semaphore_mem>> -> memref<!tpu.dma_semaphore, #tpu.memory_space<semaphore_mem>>
      tpu.enqueue_dma source(%16 : memref<32xf32, #tpu.memory_space<any>>) target(%18 : memref<32xf32, #tpu.memory_space<vmem>>) target_semaphore(%20 : memref<!tpu.dma_semaphore, #tpu.memory_space<semaphore_mem>>)
      %c1_i32_14 = arith.constant 1 : i32
      %c0_i32_15 = arith.constant 0 : i32
      %21 = tpu.memref_slice %arg4[%14, %c0_i32_15] : memref<59048x32xf32, #tpu.memory_space<any>> -> memref<1x32xf32, #tpu.memory_space<any>>
      %22 = tpu.memref_squeeze %21 : memref<1x32xf32, #tpu.memory_space<any>> -> memref<32xf32, #tpu.memory_space<any>>
      %c0_i32_16 = arith.constant 0 : i32
      %23 = tpu.memref_slice %arg7[%arg9, %c0_i32_16] : memref<512x32xf32, #tpu.memory_space<vmem>> -> memref<1x32xf32, #tpu.memory_space<vmem>>
      %24 = tpu.memref_squeeze %23 : memref<1x32xf32, #tpu.memory_space<vmem>> -> memref<32xf32, #tpu.memory_space<vmem>>
      %25 = tpu.memref_slice %arg8[%c1_i32_14] : memref<2x!tpu.dma_semaphore, #tpu.memory_space<semaphore_mem>> -> memref<1x!tpu.dma_semaphore, #tpu.memory_space<semaphore_mem>>
      %26 = tpu.memref_squeeze %25 : memref<1x!tpu.dma_semaphore, #tpu.memory_space<semaphore_mem>> -> memref<!tpu.dma_semaphore, #tpu.memory_space<semaphore_mem>>
      tpu.enqueue_dma source(%22 : memref<32xf32, #tpu.memory_space<any>>) target(%24 : memref<32xf32, #tpu.memory_space<vmem>>) target_semaphore(%26 : memref<!tpu.dma_semaphore, #tpu.memory_space<semaphore_mem>>)
    }
    %c512_i32_1 = arith.constant 512 : i32
    %c0_i32_2 = arith.constant 0 : i32
    %c512_i32_3 = arith.constant 512 : i32
    %2 = arith.addi %c0_i32_2, %c512_i32_3 : i32
    %c1_i32_4 = arith.constant 1 : i32
    scf.for %arg9 = %c0_i32_2 to %2 step %c1_i32_4  : i32 {
      %c0_i32_11 = arith.constant 0 : i32
      %c0_i32_12 = arith.constant 0 : i32
      %c0_i32_13 = arith.constant 0 : i32
      %9 = tpu.memref_slice %arg3[%c0_i32_11, %c0_i32_13] : memref<162542x32xf32, #tpu.memory_space<any>> -> memref<1x32xf32, #tpu.memory_space<any>>
      %10 = tpu.memref_squeeze %9 : memref<1x32xf32, #tpu.memory_space<any>> -> memref<32xf32, #tpu.memory_space<any>>
      %c0_i32_14 = arith.constant 0 : i32
      %11 = tpu.memref_slice %arg6[%arg9, %c0_i32_14] : memref<512x32xf32, #tpu.memory_space<vmem>> -> memref<1x32xf32, #tpu.memory_space<vmem>>
      %12 = tpu.memref_squeeze %11 : memref<1x32xf32, #tpu.memory_space<vmem>> -> memref<32xf32, #tpu.memory_space<vmem>>
      %13 = tpu.memref_slice %arg8[%c0_i32_12] : memref<2x!tpu.dma_semaphore, #tpu.memory_space<semaphore_mem>> -> memref<1x!tpu.dma_semaphore, #tpu.memory_space<semaphore_mem>>
      %14 = tpu.memref_squeeze %13 : memref<1x!tpu.dma_semaphore, #tpu.memory_space<semaphore_mem>> -> memref<!tpu.dma_semaphore, #tpu.memory_space<semaphore_mem>>
      tpu.wait_dma2 semaphore(%14 : memref<!tpu.dma_semaphore, #tpu.memory_space<semaphore_mem>>) src(%10 : memref<32xf32, #tpu.memory_space<any>>) dst(%12 : memref<32xf32, #tpu.memory_space<vmem>>)
      %c0_i32_15 = arith.constant 0 : i32
      %c1_i32_16 = arith.constant 1 : i32
      %c0_i32_17 = arith.constant 0 : i32
      %15 = tpu.memref_slice %arg4[%c0_i32_15, %c0_i32_17] : memref<59048x32xf32, #tpu.memory_space<any>> -> memref<1x32xf32, #tpu.memory_space<any>>
      %16 = tpu.memref_squeeze %15 : memref<1x32xf32, #tpu.memory_space<any>> -> memref<32xf32, #tpu.memory_space<any>>
      %c0_i32_18 = arith.constant 0 : i32
      %17 = tpu.memref_slice %arg7[%arg9, %c0_i32_18] : memref<512x32xf32, #tpu.memory_space<vmem>> -> memref<1x32xf32, #tpu.memory_space<vmem>>
      %18 = tpu.memref_squeeze %17 : memref<1x32xf32, #tpu.memory_space<vmem>> -> memref<32xf32, #tpu.memory_space<vmem>>
      %19 = tpu.memref_slice %arg8[%c1_i32_16] : memref<2x!tpu.dma_semaphore, #tpu.memory_space<semaphore_mem>> -> memref<1x!tpu.dma_semaphore, #tpu.memory_space<semaphore_mem>>
      %20 = tpu.memref_squeeze %19 : memref<1x!tpu.dma_semaphore, #tpu.memory_space<semaphore_mem>> -> memref<!tpu.dma_semaphore, #tpu.memory_space<semaphore_mem>>
      tpu.wait_dma2 semaphore(%20 : memref<!tpu.dma_semaphore, #tpu.memory_space<semaphore_mem>>) src(%16 : memref<32xf32, #tpu.memory_space<any>>) dst(%18 : memref<32xf32, #tpu.memory_space<vmem>>)
    }
    %c512_i32_5 = arith.constant 512 : i32
    %c0 = arith.constant 0 : index
    %c0_6 = arith.constant 0 : index
    %3 = vector.load %arg6[%c0, %c0_6] : memref<512x32xf32, #tpu.memory_space<vmem>>, vector<512x32xf32>
    %c0_7 = arith.constant 0 : index
    %c0_8 = arith.constant 0 : index
    %4 = vector.load %arg7[%c0_7, %c0_8] : memref<512x32xf32, #tpu.memory_space<vmem>>, vector<512x32xf32>
    %5 = arith.mulf %3, %4 : vector<512x32xf32>
    %cst = arith.constant dense<0.000000e+00> : vector<512xf32>
    %6 = vector.multi_reduction <add>, %5, %cst [1] : vector<512x32xf32> to vector<512xf32>
    %7 = vector.shape_cast %6 : vector<512xf32> to vector<512x1xf32>
    %c0_9 = arith.constant 0 : index
    %c0_10 = arith.constant 0 : index
    %8 = vector.load %arg5[%c0_9, %c0_10] : memref<512x1xf32, #tpu.memory_space<vmem>>, vector<512x1xf32>
    tpu.vector_store %arg5[%c0_9, %c0_10], %7 {strides = array<i32>} : memref<512x1xf32, #tpu.memory_space<vmem>>, vector<512x1xf32>,
    return
  }
  func.func @transform_2(%arg0: i32, %arg1: memref<1024xi32, #tpu.memory_space<smem>>, %arg2: memref<1024xi32, #tpu.memory_space<smem>>) -> (i32, i32) {
    %c0_i32 = arith.constant 0 : i32
    %c0_i32_0 = arith.constant 0 : i32
    return %arg0, %c0_i32 : i32, i32
  }
}

</mosaic_0001>

<bundles_post_ra>
// kernel: tpu_custom_call.1
= control target key start
LH: loop header
LB: loop body
LE: loop exit
PB: predicated region body
PF: predicated region fallthrough
CT: control target
= control target key end

     0   :  { %s1056_s0 = inlined_call_operand.vmem [shape: s32[1024], index: 0, kind: input, shape index: {}]   ;;  %s1057_s2 = inlined_call_operand.vmem [shape: f32[162542,32], index: 2, kind: input, shape index: {}]   ;;  %s1058_s3 = inlined_call_operand.hbm [shape: f32[59048,32], index: 3, kind: input, shape index: {}]   ;;  %s1059_s4 = inlined_call_operand.vmem [shape: f32[1024,1], index: 4, kind: output, shape index: {}]   ;;  %s1060_s1 = inlined_call_operand.vmem [shape: s32[1024], index: 1, kind: input, shape index: {}]  }
   0x1   :  { %s9_s17 = sshll.u32 %s1056_s0, 4  ;;  %s13_s20 = sshll.u32 %s1060_s1, 4  ;;  %s10_s17 = int_to_ptr.vmem [resolvable:$true] %s9_s17  ;;  %s14_s20 = int_to_ptr.vmem [resolvable:$true] %s13_s20 }
   0x2   :  { %s713_s21 = scalar_lea.vmem %s10_s17, 128  ;;  %p718_p1 = scmp.lt.s32.totalorder %s10_s17, %s10_s17 }
   0x3   :  { %p714_p0 = scmp.ne.s32.totalorder %s10_s17, %s713_s21  ;;  %p719_p2 = scmp.lt.s32.totalorder %s713_s21, %s713_s21 }
   0x5   :  { %p720_p3 = por %p719_p2, %p718_p1 }
   0x7   :  { %p721_p4 = pnand %p720_p3, %p714_p0 }
   0x9   :  { %724 = shalt.err (!%p721_p4)  }
   0xa   :  { %s789_s22 = smov [#allocation6]   ;;  %s725_s23 = scalar_lea.vmem %s14_s20, 128 }
   0xb   :  { %12 = dma.vmem_to_smem %s10_s17, 128, %s789_s22, [#allocation5] }
   0xc   :  { %p726_p5 = scmp.ne.s32.totalorder %s14_s20, %s725_s23  ;;  %p730_p6 = scmp.lt.s32.totalorder %s14_s20, %s14_s20 }
   0xd   :  { %p731_p7 = scmp.lt.s32.totalorder %s725_s23, %s725_s23 }
   0xf   :  { %p732_p8 = por %p731_p7, %p730_p6 }
  0x11   :  { %p733_p9 = pnand %p732_p8, %p726_p5 }
  0x13   :  { %736 = shalt.err (!%p733_p9)  }
  0x14   :  { %s790_s0 = smov [#allocation7]  }
  0x15   :  { %16 = dma.vmem_to_smem %s14_s20, 128, %s790_s0, [#allocation5] }
  0x16   :  { %771 = dma.done.wait [#allocation5], 256 }
  0x17   :  { %772 = vsyncadd [#allocation5], 4294967040 }
  0x18   :  { %18 = sfence }
  0x19   :  { %s823_s1 = smov 0  }
  0x1a LB: > { %p678_p10 = scmp.ge.s32.totalorder %s779_s1, 2  ;;  %s779_s1 = sphi %s823_s1, %s24_s1  }
  0x1b   : > { %s679_s24 = sshll.u32 (!%p678_p10), %s779_s1, 6  ;;  %s681_s25 = sshll.u32 (!%p678_p10), %s779_s1, 9 }
  0x1c   : > { %49 = sbr.rel (%p678_p10) target bundleno = 349 (0x15d), region = 12  ;;  %p58_p11 = scmp.lt.s32.totalorder (!%p678_p10), %s679_s24, 127 }
  0x1d   : > { %s836_s30 = smov (!%p678_p10), 0  }
  0x21   : > { %s1062_s24 = smov (!%p58_p11, %s679_s24), 127 }
  0x22   : > { %s680_s26 = sshll.u32 %s1062_s24, 3 }
  0x23   : > { %s834_s29 = scalar_lea.vmem %s1059_s4, %s680_s26 }
  0x24 LB: >> { %s70_s5 = sadd.s32 %s783_s30, %s681_s25  ;;  %s74_s11 = scalar_lea.vmem [#allocation2], %s783_s30  ;;  %s783_s30 = sphi %s836_s30, %s69_s30  }
  0x25   : >> { %s71_s6 = sld [smem:[#allocation6 + %s70_s5]] }
  0x26   : >> { %s72_s7 = sld [smem:[#allocation7 + %s70_s5]] }
  0x2b   : >> { %s73_s10 = scalar_lea.vmem %s1057_s2, %s71_s6 }
  0x2c   : >> { %v93_v0 = vld [vmem:[%s73_s10] sm:$0x1] }
  0x2d   : >> { %94 = vst [vmem:[%s74_s11] sm:$0x1] %v93_v0 }
  0x2e   : >> { %120 = vsyncadd [#allocation4], 16  ;;  %s682_s12 = sshll.u32 %s72_s7, 4  ;;  %s123_s16 = scalar_lea.vmem [#allocation3], %s783_s30 }
  0x2f   : >> { %s122_s15 = scalar_lea.hbm %s1058_s3, %s682_s12  ;;  %s132_s17 = sshll.u32 %s123_s16, 4  ;;  %s133_s17 = int_to_ptr.vmem [resolvable:$true] %s132_s17 }
  0x30   : >> { %s737_s18 = scalar_lea.hbm %s122_s15, 16  ;;  %s739_s21 = scalar_lea.hbm %s1058_s3, 944768 }
  0x31   : >> { %p738_p12 = scmp.ne.s32.totalorder %s122_s15, %s737_s18  ;;  %p740_p13 = scmp.lt.s32.totalorder %s122_s15, %s1058_s3 }
  0x32   : >> { %p741_p0 = scmp.lt.s32.totalorder %s739_s21, %s737_s18 }
  0x34   : >> { %p742_p1 = por %p741_p0, %p740_p13 }
  0x36   : >> { %p743_p2 = pnand %p742_p1, %p738_p12 }
  0x38   : >> { %746 = shalt.err (!%p743_p2)  }
  0x39   : >> { %s747_s0 = scalar_lea.vmem %s133_s17, 16  ;;  %s791_s24 = smov [#allocation3]  }
  0x3a   : >> { %p748_p3 = scmp.ne.s32.totalorder %s133_s17, %s747_s0  ;;  %s749_s26 = sshll.u32 %s791_s24, 4  ;;  %s750_s26 = int_to_ptr.vmem [resolvable:$false] %s749_s26 }
  0x3b   : >> { %s751_s27 = scalar_lea.vmem %s750_s26, 8192  ;;  %p752_p4 = scmp.lt.s32.totalorder %s133_s17, %s750_s26 }
  0x3c   : >> { %p753_p5 = scmp.lt.s32.totalorder %s751_s27, %s747_s0 }
  0x3e   : >> { %p754_p6 = por %p753_p5, %p752_p4 }
  0x40   : >> { %p755_p7 = pnand %p754_p6, %p748_p3 }
  0x42   : >> { %758 = shalt.err (!%p755_p7)  }
  0x43   : >> { %135 = dma.hbm_to_vmem [thread:$0]  %s122_s15, 16, %s133_s17, [#allocation4 + $0x1] }
  0x44   : >> { %s69_s30 = sadd.s32 1, %s783_s30  }
  0x45   : >> { %p66_p8 = scmp.ge.s32.totalorder %s69_s30, 512  }
  0x46   : > { %s785_s28 = smov (%p66_p8), 0  }
  0x47   : > { %68 = sbr.rel (!%p66_p8) target bundleno = 36 (0x24), region = 104 }
  0x4c LB: >> { %773 = dma.done.wait [#allocation4], 16  ;;  %s787_s28 = sphi %s785_s28, %s141_s28  }
  0x4d   : >> { %774 = vsyncadd [#allocation4], 4294967280 }
  0x4e   : >> { %775 = dma.done.wait [#allocation4 + $0x1], 16 }
  0x4f   : >> { %776 = vsyncadd [#allocation4 + $0x1], 4294967280  ;;  %s141_s28 = sadd.s32 1, %s787_s28  }
  0x50   : >> { %p138_p9 = scmp.ge.s32.totalorder %s141_s28, 512  }
  0x51   : > { %v149_v1 = vld [vmem:[#allocation2 + $0x10] sm:$0xff] (%p138_p9)  ;;  %vm339_vm0 = vcmask (%p138_p9), 261120   ;;  %v147_v3 = vld [vmem:[#allocation2] sm:$0xff] (%p138_p9)  ;;  %v150_v6 = vld [vmem:[#allocation2 + $0x18] sm:$0xff] (%p138_p9)  ;;  %vm532_vm1 = vcmask (%p138_p9), 7168  }
  0x52   : > { %140 = sbr.rel (!%p138_p9) target bundleno = 76 (0x4c), region = 115  ;;  %v213_v2 = vld [vmem:[#allocation3 + $0x10] sm:$0xff] (%p138_p9)  ;;  %v211_v5 = vld [vmem:[#allocation3] sm:$0xff] (%p138_p9)  ;;  %v214_v7 = vld [vmem:[#allocation3 + $0x18] sm:$0xff] (%p138_p9) }
  0x53   : > { %v277_v4 = vmul.f32 (%p138_p9), %v213_v2, %v149_v1  ;;  %v275_v8 = vmul.f32 (%p138_p9), %v211_v5, %v147_v3  ;;  %v278_v9 = vmul.f32 (%p138_p9), %v214_v7, %v150_v6  ;;  %v148_v10 = vld [vmem:[#allocation2 + $0x8] sm:$0xff] (%p138_p9)  ;;  %v151_v16 = vld [vmem:[#allocation2 + $0x20] sm:$0xff] (%p138_p9)  ;;  %v154_v23 = vld [vmem:[#allocation2 + $0x38] sm:$0xff] (%p138_p9) }
  0x54   : > { %v212_v11 = vld [vmem:[#allocation3 + $0x8] sm:$0xff] (%p138_p9)  ;;  %v215_v17 = vld [vmem:[#allocation3 + $0x20] sm:$0xff] (%p138_p9)  ;;  %v218_v24 = vld [vmem:[#allocation3 + $0x38] sm:$0xff] (%p138_p9) }
  0x55   : > { %v152_v12 = vld [vmem:[#allocation2 + $0x28] sm:$0xff] (%p138_p9)  ;;  %v346_v13 = vsel (%p138_p9), %vm339_vm0, %v277_v4, 0.0  ;;  %v276_v14 = vmul.f32 (%p138_p9), %v212_v11, %v148_v10  ;;  %v340_v18 = vsel (%p138_p9), %vm339_vm0, %v275_v8, 0.0  ;;  %v349_v19 = vsel (%p138_p9), %vm339_vm0, %v278_v9, 0.0  ;;  %v153_v25 = vld [vmem:[#allocation2 + $0x30] sm:$0xff] (%p138_p9)  ;;  %v155_v33 = vld [vmem:[#allocation2 + $0x40] sm:$0xff] (%p138_p9) }
  0x56   : > { %v216_v15 = vld [vmem:[#allocation3 + $0x28] sm:$0xff] (%p138_p9)  ;;  %347 = vadd.xlane.f32.xlu1 (%p138_p9), %v346_v13  ;;  %341 = vadd.xlane.f32.xlu0 (%p138_p9), %v340_v18  ;;  %v279_v22 = vmul.f32 (%p138_p9), %v215_v17, %v151_v16  ;;  %v217_v26 = vld [vmem:[#allocation3 + $0x30] sm:$0xff] (%p138_p9)  ;;  %v282_v28 = vmul.f32 (%p138_p9), %v218_v24, %v154_v23  ;;  %v219_v34 = vld [vmem:[#allocation3 + $0x40] sm:$0xff] (%p138_p9) }
  0x57   : > { %v280_v20 = vmul.f32 %v216_v15, %v152_v12  ;;  %v343_v21 = vsel %vm339_vm0, %v276_v14, 0.0  ;;  %v281_v30 = vmul.f32 %v217_v26, %v153_v25  ;;  %v156_v31 = vld [vmem:[#allocation2 + $0x48] sm:$0xff]  ;;  %v283_v38 = vmul.f32 %v219_v34, %v155_v33  ;;  %v158_v39 = vld [vmem:[#allocation2 + $0x58] sm:$0xff]  ;;  %v157_v41 = vld [vmem:[#allocation2 + $0x50] sm:$0xff] }
  0x58   : > { %v352_v29 = vsel %vm339_vm0, %v279_v22, 0.0  ;;  %v220_v32 = vld [vmem:[#allocation3 + $0x48] sm:$0xff]  ;;  %v361_v35 = vsel %vm339_vm0, %v282_v28, 0.0  ;;  %v222_v40 = vld [vmem:[#allocation3 + $0x58] sm:$0xff]  ;;  %v221_v42 = vld [vmem:[#allocation3 + $0x50] sm:$0xff] }
  0x59   : > { %v355_v27 = vsel %vm339_vm0, %v280_v20, 0.0  ;;  %v284_v36 = vmul.f32 %v220_v32, %v156_v31  ;;  %v358_v37 = vsel %vm339_vm0, %v281_v30, 0.0  ;;  %v286_v44 = vmul.f32 %v222_v40, %v158_v39  ;;  %v160_v47 = vld [vmem:[#allocation2 + $0x68] sm:$0xff]  ;;  %v159_v49 = vld [vmem:[#allocation2 + $0x60] sm:$0xff]  ;;  %v162_v55 = vld [vmem:[#allocation2 + $0x78] sm:$0xff] }
  0x5a   : > { %350 = vadd.xlane.f32.xlu1 %v349_v19  ;;  %344 = vadd.xlane.f32.xlu0 %v343_v21  ;;  %v364_v45 = vsel %vm339_vm0, %v283_v38, 0.0  ;;  %v285_v46 = vmul.f32 %v221_v42, %v157_v41  ;;  %v224_v48 = vld [vmem:[#allocation3 + $0x68] sm:$0xff]  ;;  %v223_v50 = vld [vmem:[#allocation3 + $0x60] sm:$0xff]  ;;  %v226_v56 = vld [vmem:[#allocation3 + $0x78] sm:$0xff] }
  0x5b   : > { %v367_v43 = vsel %vm339_vm0, %v284_v36, 0.0  ;;  %v373_v51 = vsel %vm339_vm0, %v286_v44, 0.0  ;;  %v288_v52 = vmul.f32 %v224_v48, %v160_v47  ;;  %v287_v54 = vmul.f32 %v223_v50, %v159_v49  ;;  %v161_v57 = vld [vmem:[#allocation2 + $0x70] sm:$0xff]  ;;  %v164_v63 = vld [vmem:[#allocation2 + $0x88] sm:$0xff]  ;;  %v163_v1 = vld [vmem:[#allocation2 + $0x80] sm:$0xff] }
  0x5c   : > { %v370_v53 = vsel %vm339_vm0, %v285_v46, 0.0  ;;  %v225_v58 = vld [vmem:[#allocation3 + $0x70] sm:$0xff]  ;;  %v290_v60 = vmul.f32 %v226_v56, %v162_v55  ;;  %v228_v0 = vld [vmem:[#allocation3 + $0x88] sm:$0xff]  ;;  %v227_v2 = vld [vmem:[#allocation3 + $0x80] sm:$0xff] }
  0x5d   : > { %v379_v59 = vsel %vm339_vm0, %v288_v52, 0.0  ;;  %v376_v61 = vsel %vm339_vm0, %v287_v54, 0.0  ;;  %v289_v62 = vmul.f32 %v225_v58, %v161_v57  ;;  %v292_v4 = vmul.f32 %v228_v0, %v164_v63  ;;  %v166_v7 = vld [vmem:[#allocation2 + $0x98] sm:$0xff]  ;;  %v165_v9 = vld [vmem:[#allocation2 + $0x90] sm:$0xff]  ;;  %v168_v15 = vld [vmem:[#allocation2 + $0xa8] sm:$0xff] }
  0x5e   : > { %356 = vadd.xlane.f32.xlu1 %v355_v27  ;;  %353 = vadd.xlane.f32.xlu0 %v352_v29  ;;  %v385_v3 = vsel %vm339_vm0, %v290_v60, 0.0  ;;  %v291_v6 = vmul.f32 %v227_v2, %v163_v1  ;;  %v230_v8 = vld [vmem:[#allocation3 + $0x98] sm:$0xff]  ;;  %v229_v10 = vld [vmem:[#allocation3 + $0x90] sm:$0xff]  ;;  %v232_v16 = vld [vmem:[#allocation3 + $0xa8] sm:$0xff] }
  0x5f   : > { %v382_v5 = vsel %vm339_vm0, %v289_v62, 0.0  ;;  %v391_v11 = vsel %vm339_vm0, %v292_v4, 0.0  ;;  %v294_v12 = vmul.f32 %v230_v8, %v166_v7  ;;  %v293_v14 = vmul.f32 %v229_v10, %v165_v9  ;;  %v167_v17 = vld [vmem:[#allocation2 + $0xa0] sm:$0xff]  ;;  %v170_v23 = vld [vmem:[#allocation2 + $0xb8] sm:$0xff]  ;;  %v169_v25 = vld [vmem:[#allocation2 + $0xb0] sm:$0xff] }
  0x60   : > { %v388_v13 = vsel %vm339_vm0, %v291_v6, 0.0  ;;  %v231_v18 = vld [vmem:[#allocation3 + $0xa0] sm:$0xff]  ;;  %v296_v20 = vmul.f32 %v232_v16, %v168_v15  ;;  %v234_v24 = vld [vmem:[#allocation3 + $0xb8] sm:$0xff]  ;;  %v233_v26 = vld [vmem:[#allocation3 + $0xb0] sm:$0xff] }
  0x61   : > { %v397_v19 = vsel %vm339_vm0, %v294_v12, 0.0  ;;  %v394_v21 = vsel %vm339_vm0, %v293_v14, 0.0  ;;  %v295_v22 = vmul.f32 %v231_v18, %v167_v17  ;;  %v298_v28 = vmul.f32 %v234_v24, %v170_v23  ;;  %v172_v31 = vld [vmem:[#allocation2 + $0xc8] sm:$0xff]  ;;  %v171_v33 = vld [vmem:[#allocation2 + $0xc0] sm:$0xff]  ;;  %v174_v39 = vld [vmem:[#allocation2 + $0xd8] sm:$0xff] }
  0x62   : > { %362 = vadd.xlane.f32.xlu1 %v361_v35  ;;  %359 = vadd.xlane.f32.xlu0 %v358_v37  ;;  %v403_v27 = vsel %vm339_vm0, %v296_v20, 0.0  ;;  %v297_v30 = vmul.f32 %v233_v26, %v169_v25  ;;  %v236_v32 = vld [vmem:[#allocation3 + $0xc8] sm:$0xff]  ;;  %v235_v34 = vld [vmem:[#allocation3 + $0xc0] sm:$0xff]  ;;  %v238_v40 = vld [vmem:[#allocation3 + $0xd8] sm:$0xff] }
  0x63   : > { %v400_v29 = vsel %vm339_vm0, %v295_v22, 0.0  ;;  %v409_v35 = vsel %vm339_vm0, %v298_v28, 0.0  ;;  %v300_v36 = vmul.f32 %v236_v32, %v172_v31  ;;  %v299_v38 = vmul.f32 %v235_v34, %v171_v33  ;;  %v173_v41 = vld [vmem:[#allocation2 + $0xd0] sm:$0xff]  ;;  %v176_v47 = vld [vmem:[#allocation2 + $0xe8] sm:$0xff]  ;;  %v175_v49 = vld [vmem:[#allocation2 + $0xe0] sm:$0xff] }
  0x64   : > { %v406_v37 = vsel %vm339_vm0, %v297_v30, 0.0  ;;  %v237_v42 = vld [vmem:[#allocation3 + $0xd0] sm:$0xff]  ;;  %v302_v44 = vmul.f32 %v238_v40, %v174_v39  ;;  %v240_v48 = vld [vmem:[#allocation3 + $0xe8] sm:$0xff]  ;;  %v239_v50 = vld [vmem:[#allocation3 + $0xe0] sm:$0xff] }
  0x65   : > { %v301_v46 = vmul.f32 %v237_v42, %v173_v41  ;;  %v304_v52 = vmul.f32 %v240_v48, %v176_v47  ;;  %v303_v54 = vmul.f32 %v239_v50, %v175_v49  ;;  %v178_v55 = vld [vmem:[#allocation2 + $0xf8] sm:$0xff]  ;;  %v177_v57 = vld [vmem:[#allocation2 + $0xf0] sm:$0xff]  ;;  %v180_v63 = vld [vmem:[#allocation2 + $0x108] sm:$0xff] }
  0x66   : > { %368 = vadd.xlane.f32.xlu1 %v367_v43  ;;  %365 = vadd.xlane.f32.xlu0 %v364_v45  ;;  %v415_v43 = vsel %vm339_vm0, %v300_v36, 0.0  ;;  %v412_v45 = vsel %vm339_vm0, %v299_v38, 0.0  ;;  %v242_v56 = vld [vmem:[#allocation3 + $0xf8] sm:$0xff]  ;;  %v241_v58 = vld [vmem:[#allocation3 + $0xf0] sm:$0xff]  ;;  %v244_v0 = vld [vmem:[#allocation3 + $0x108] sm:$0xff] }
  0x67   : > { %v306_v60 = vmul.f32 %v242_v56, %v178_v55  ;;  %v305_v62 = vmul.f32 %v241_v58, %v177_v57  ;;  %v179_v1 = vld [vmem:[#allocation2 + $0x100] sm:$0xff]  ;;  %v308_v4 = vmul.f32 %v244_v0, %v180_v63  ;;  %v182_v7 = vld [vmem:[#allocation2 + $0x118] sm:$0xff]  ;;  %v181_v9 = vld [vmem:[#allocation2 + $0x110] sm:$0xff] }
  0x68   : > { %v243_v2 = vld [vmem:[#allocation3 + $0x100] sm:$0xff]  ;;  %v246_v8 = vld [vmem:[#allocation3 + $0x118] sm:$0xff]  ;;  %v245_v10 = vld [vmem:[#allocation3 + $0x110] sm:$0xff] }
  0x69   : > { %v307_v6 = vmul.f32 %v243_v2, %v179_v1  ;;  %v310_v12 = vmul.f32 %v246_v8, %v182_v7  ;;  %v309_v14 = vmul.f32 %v245_v10, %v181_v9  ;;  %v184_v15 = vld [vmem:[#allocation2 + $0x128] sm:$0xff]  ;;  %v183_v17 = vld [vmem:[#allocation2 + $0x120] sm:$0xff]  ;;  %v186_v23 = vld [vmem:[#allocation2 + $0x138] sm:$0xff] }
  0x6a   : > { %374 = vadd.xlane.f32.xlu1 %v373_v51  ;;  %371 = vadd.xlane.f32.xlu0 %v370_v53  ;;  %v421_v51 = vsel %vm339_vm0, %v302_v44, 0.0  ;;  %v418_v53 = vsel %vm339_vm0, %v301_v46, 0.0  ;;  %v248_v16 = vld [vmem:[#allocation3 + $0x128] sm:$0xff]  ;;  %v247_v18 = vld [vmem:[#allocation3 + $0x120] sm:$0xff]  ;;  %v250_v24 = vld [vmem:[#allocation3 + $0x138] sm:$0xff] }
  0x6b   : > { %v312_v20 = vmul.f32 %v248_v16, %v184_v15  ;;  %v311_v22 = vmul.f32 %v247_v18, %v183_v17  ;;  %v185_v25 = vld [vmem:[#allocation2 + $0x130] sm:$0xff]  ;;  %v314_v28 = vmul.f32 %v250_v24, %v186_v23  ;;  %v188_v31 = vld [vmem:[#allocation2 + $0x148] sm:$0xff]  ;;  %v187_v33 = vld [vmem:[#allocation2 + $0x140] sm:$0xff] }
  0x6c   : > { %v249_v26 = vld [vmem:[#allocation3 + $0x130] sm:$0xff]  ;;  %v252_v32 = vld [vmem:[#allocation3 + $0x148] sm:$0xff]  ;;  %v251_v34 = vld [vmem:[#allocation3 + $0x140] sm:$0xff] }
  0x6d   : > { %v313_v30 = vmul.f32 %v249_v26, %v185_v25  ;;  %v316_v36 = vmul.f32 %v252_v32, %v188_v31  ;;  %v315_v38 = vmul.f32 %v251_v34, %v187_v33  ;;  %v190_v39 = vld [vmem:[#allocation2 + $0x158] sm:$0xff]  ;;  %v189_v41 = vld [vmem:[#allocation2 + $0x150] sm:$0xff]  ;;  %v192_v47 = vld [vmem:[#allocation2 + $0x168] sm:$0xff] }
  0x6e   : > { %380 = vadd.xlane.f32.xlu1 %v379_v59  ;;  %377 = vadd.xlane.f32.xlu0 %v376_v61  ;;  %v427_v59 = vsel %vm339_vm0, %v304_v52, 0.0  ;;  %v424_v61 = vsel %vm339_vm0, %v303_v54, 0.0  ;;  %v254_v40 = vld [vmem:[#allocation3 + $0x158] sm:$0xff]  ;;  %v253_v42 = vld [vmem:[#allocation3 + $0x150] sm:$0xff]  ;;  %v256_v48 = vld [vmem:[#allocation3 + $0x168] sm:$0xff] }
  0x6f   : > { %v318_v44 = vmul.f32 %v254_v40, %v190_v39  ;;  %v317_v46 = vmul.f32 %v253_v42, %v189_v41  ;;  %v191_v49 = vld [vmem:[#allocation2 + $0x160] sm:$0xff]  ;;  %v320_v52 = vmul.f32 %v256_v48, %v192_v47  ;;  %v194_v55 = vld [vmem:[#allocation2 + $0x178] sm:$0xff]  ;;  %v193_v57 = vld [vmem:[#allocation2 + $0x170] sm:$0xff] }
  0x70   : > { %v255_v50 = vld [vmem:[#allocation3 + $0x160] sm:$0xff]  ;;  %v258_v56 = vld [vmem:[#allocation3 + $0x178] sm:$0xff]  ;;  %v257_v58 = vld [vmem:[#allocation3 + $0x170] sm:$0xff] }
  0x71   : > { %v319_v54 = vmul.f32 %v255_v50, %v191_v49  ;;  %v196_v63 = vld [vmem:[#allocation2 + $0x188] sm:$0xff]  ;;  %v195_v1 = vld [vmem:[#allocation2 + $0x180] sm:$0xff]  ;;  %v198_v7 = vld [vmem:[#allocation2 + $0x198] sm:$0xff] }
  0x72   : > { %386 = vadd.xlane.f32.xlu1 %v385_v3  ;;  %383 = vadd.xlane.f32.xlu0 %v382_v5  ;;  %v433_v3 = vsel %vm339_vm0, %v306_v60, 0.0  ;;  %v430_v5 = vsel %vm339_vm0, %v305_v62, 0.0  ;;  %v322_v60 = vmul.f32 %v258_v56, %v194_v55  ;;  %v321_v62 = vmul.f32 %v257_v58, %v193_v57  ;;  %v260_v0 = vld [vmem:[#allocation3 + $0x188] sm:$0xff]  ;;  %v259_v2 = vld [vmem:[#allocation3 + $0x180] sm:$0xff]  ;;  %v262_v8 = vld [vmem:[#allocation3 + $0x198] sm:$0xff] }
  0x73   : > { %v197_v9 = vld [vmem:[#allocation2 + $0x190] sm:$0xff]  ;;  %v200_v15 = vld [vmem:[#allocation2 + $0x1a8] sm:$0xff]  ;;  %v199_v17 = vld [vmem:[#allocation2 + $0x1a0] sm:$0xff] }
  0x74   : > { %v261_v10 = vld [vmem:[#allocation3 + $0x190] sm:$0xff]  ;;  %v264_v16 = vld [vmem:[#allocation3 + $0x1a8] sm:$0xff]  ;;  %v263_v18 = vld [vmem:[#allocation3 + $0x1a0] sm:$0xff] }
  0x75   : > { %v202_v23 = vld [vmem:[#allocation2 + $0x1b8] sm:$0xff]  ;;  %v201_v25 = vld [vmem:[#allocation2 + $0x1b0] sm:$0xff]  ;;  %v204_v31 = vld [vmem:[#allocation2 + $0x1c8] sm:$0xff] }
  0x76   : > { %392 = vadd.xlane.f32.xlu1 %v391_v11  ;;  %389 = vadd.xlane.f32.xlu0 %v388_v13  ;;  %v439_v11 = vsel %vm339_vm0, %v308_v4, 0.0  ;;  %v436_v13 = vsel %vm339_vm0, %v307_v6, 0.0  ;;  %v324_v4 = vmul.f32 %v260_v0, %v196_v63  ;;  %v323_v6 = vmul.f32 %v259_v2, %v195_v1  ;;  %v266_v24 = vld [vmem:[#allocation3 + $0x1b8] sm:$0xff]  ;;  %v265_v26 = vld [vmem:[#allocation3 + $0x1b0] sm:$0xff]  ;;  %v268_v32 = vld [vmem:[#allocation3 + $0x1c8] sm:$0xff] }
  0x77   : > { %v203_v33 = vld [vmem:[#allocation2 + $0x1c0] sm:$0xff]  ;;  %v206_v39 = vld [vmem:[#allocation2 + $0x1d8] sm:$0xff]  ;;  %v205_v41 = vld [vmem:[#allocation2 + $0x1d0] sm:$0xff] }
  0x78   : > { %v267_v34 = vld [vmem:[#allocation3 + $0x1c0] sm:$0xff]  ;;  %v270_v40 = vld [vmem:[#allocation3 + $0x1d8] sm:$0xff]  ;;  %v269_v42 = vld [vmem:[#allocation3 + $0x1d0] sm:$0xff] }
  0x79   : > { %v208_v47 = vld [vmem:[#allocation2 + $0x1e8] sm:$0xff]  ;;  %v207_v49 = vld [vmem:[#allocation2 + $0x1e0] sm:$0xff]  ;;  %v210_v55 = vld [vmem:[#allocation2 + $0x1f8] sm:$0xff] }
  0x7a   : > { %398 = vadd.xlane.f32.xlu1 %v397_v19  ;;  %395 = vadd.xlane.f32.xlu0 %v394_v21  ;;  %v445_v19 = vsel %vm339_vm0, %v310_v12, 0.0  ;;  %v442_v21 = vsel %vm339_vm0, %v309_v14, 0.0  ;;  %v326_v12 = vmul.f32 %v262_v8, %v198_v7  ;;  %v325_v14 = vmul.f32 %v261_v10, %v197_v9  ;;  %v272_v48 = vld [vmem:[#allocation3 + $0x1e8] sm:$0xff]  ;;  %v271_v50 = vld [vmem:[#allocation3 + $0x1e0] sm:$0xff]  ;;  %v274_v56 = vld [vmem:[#allocation3 + $0x1f8] sm:$0xff] }
  0x7b   : > { %v209_v57 = vld [vmem:[#allocation2 + $0x1f0] sm:$0xff] }
  0x7c   : > { %v273_v58 = vld [vmem:[#allocation3 + $0x1f0] sm:$0xff] }
  0x7e   : > { %404 = vadd.xlane.f32.xlu1 %v403_v27  ;;  %401 = vadd.xlane.f32.xlu0 %v400_v29  ;;  %v451_v27 = vsel %vm339_vm0, %v312_v20, 0.0  ;;  %v448_v29 = vsel %vm339_vm0, %v311_v22, 0.0  ;;  %v328_v20 = vmul.f32 %v264_v16, %v200_v15  ;;  %v327_v22 = vmul.f32 %v263_v18, %v199_v17 }
  0x82   : > { %410 = vadd.xlane.f32.xlu1 %v409_v35  ;;  %407 = vadd.xlane.f32.xlu0 %v406_v37  ;;  %v457_v35 = vsel %vm339_vm0, %v314_v28, 0.0  ;;  %v454_v37 = vsel %vm339_vm0, %v313_v30, 0.0  ;;  %v330_v28 = vmul.f32 %v266_v24, %v202_v23  ;;  %v329_v30 = vmul.f32 %v265_v26, %v201_v25 }
  0x86   : > { %416 = vadd.xlane.f32.xlu1 %v415_v43  ;;  %413 = vadd.xlane.f32.xlu0 %v412_v45  ;;  %v463_v43 = vsel %vm339_vm0, %v316_v36, 0.0  ;;  %v460_v45 = vsel %vm339_vm0, %v315_v38, 0.0  ;;  %v332_v36 = vmul.f32 %v268_v32, %v204_v31  ;;  %v331_v38 = vmul.f32 %v267_v34, %v203_v33 }
  0x8a   : > { %422 = vadd.xlane.f32.xlu1 %v421_v51  ;;  %419 = vadd.xlane.f32.xlu0 %v418_v53  ;;  %v469_v51 = vsel %vm339_vm0, %v318_v44, 0.0  ;;  %v466_v53 = vsel %vm339_vm0, %v317_v46, 0.0  ;;  %v334_v44 = vmul.f32 %v270_v40, %v206_v39  ;;  %v333_v46 = vmul.f32 %v269_v42, %v205_v41 }
  0x8e   : > { %428 = vadd.xlane.f32.xlu1 %v427_v59  ;;  %425 = vadd.xlane.f32.xlu0 %v424_v61  ;;  %v475_v59 = vsel %vm339_vm0, %v320_v52, 0.0  ;;  %v472_v61 = vsel %vm339_vm0, %v319_v54, 0.0  ;;  %v336_v52 = vmul.f32 %v272_v48, %v208_v47  ;;  %v335_v54 = vmul.f32 %v271_v50, %v207_v49 }
  0x92   : > { %434 = vadd.xlane.f32.xlu1 %v433_v3  ;;  %431 = vadd.xlane.f32.xlu0 %v430_v5  ;;  %v481_v3 = vsel %vm339_vm0, %v322_v60, 0.0  ;;  %v478_v5 = vsel %vm339_vm0, %v321_v62, 0.0  ;;  %v338_v60 = vmul.f32 %v274_v56, %v210_v55  ;;  %v337_v62 = vmul.f32 %v273_v58, %v209_v57 }
  0x94   : > { %v529_v63 = vsel %vm339_vm0, %v338_v60, 0.0  ;;  %v526_v0 = vsel %vm339_vm0, %v337_v62, 0.0 }
  0x96   : > { %440 = vadd.xlane.f32.xlu1 %v439_v11  ;;  %437 = vadd.xlane.f32.xlu0 %v436_v13  ;;  %v487_v11 = vsel %vm339_vm0, %v324_v4, 0.0  ;;  %v484_v13 = vsel %vm339_vm0, %v323_v6, 0.0 }
  0x9a   : > { %446 = vadd.xlane.f32.xlu1 %v445_v19  ;;  %443 = vadd.xlane.f32.xlu0 %v442_v21  ;;  %v493_v19 = vsel %vm339_vm0, %v326_v12, 0.0  ;;  %v490_v21 = vsel %vm339_vm0, %v325_v14, 0.0 }
  0x9e   : > { %452 = vadd.xlane.f32.xlu1 %v451_v27  ;;  %449 = vadd.xlane.f32.xlu0 %v448_v29  ;;  %v499_v27 = vsel %vm339_vm0, %v328_v20, 0.0  ;;  %v496_v29 = vsel %vm339_vm0, %v327_v22, 0.0 }
  0xa2   : > { %458 = vadd.xlane.f32.xlu1 %v457_v35  ;;  %455 = vadd.xlane.f32.xlu0 %v454_v37  ;;  %v505_v35 = vsel %vm339_vm0, %v330_v28, 0.0  ;;  %v502_v37 = vsel %vm339_vm0, %v329_v30, 0.0 }
  0xa6   : > { %464 = vadd.xlane.f32.xlu1 %v463_v43  ;;  %461 = vadd.xlane.f32.xlu0 %v460_v45  ;;  %v511_v43 = vsel %vm339_vm0, %v332_v36, 0.0  ;;  %v508_v45 = vsel %vm339_vm0, %v331_v38, 0.0 }
  0xaa   : > { %470 = vadd.xlane.f32.xlu1 %v469_v51  ;;  %467 = vadd.xlane.f32.xlu0 %v466_v53  ;;  %v517_v51 = vsel %vm339_vm0, %v334_v44, 0.0  ;;  %v514_v53 = vsel %vm339_vm0, %v333_v46, 0.0 }
  0xae   : > { %476 = vadd.xlane.f32.xlu1 %v475_v59  ;;  %473 = vadd.xlane.f32.xlu0 %v472_v61  ;;  %v523_v59 = vsel %vm339_vm0, %v336_v52, 0.0  ;;  %v520_v61 = vsel %vm339_vm0, %v335_v54, 0.0 }
  0xb2   : > { %482 = vadd.xlane.f32.xlu1 %v481_v3  ;;  %479 = vadd.xlane.f32.xlu0 %v478_v5 }
  0xb6   : > { %488 = vadd.xlane.f32.xlu1 %v487_v11  ;;  %485 = vadd.xlane.f32.xlu0 %v484_v13 }
  0xba   : > { %494 = vadd.xlane.f32.xlu1 %v493_v19  ;;  %491 = vadd.xlane.f32.xlu0 %v490_v21 }
  0xbe   : > { %500 = vadd.xlane.f32.xlu1 %v499_v27  ;;  %497 = vadd.xlane.f32.xlu0 %v496_v29 }
  0xc2   : > { %506 = vadd.xlane.f32.xlu1 %v505_v35  ;;  %503 = vadd.xlane.f32.xlu0 %v502_v37 }
  0xc6   : > { %512 = vadd.xlane.f32.xlu1 %v511_v43  ;;  %509 = vadd.xlane.f32.xlu0 %v508_v45 }
  0xca   : > { %518 = vadd.xlane.f32.xlu1 %v517_v51  ;;  %515 = vadd.xlane.f32.xlu0 %v514_v53 }
  0xce   : > { %524 = vadd.xlane.f32.xlu1 %v523_v59  ;;  %521 = vadd.xlane.f32.xlu0 %v520_v61 }
  0xd2   : > { %530 = vadd.xlane.f32.xlu1 %v529_v63  ;;  %527 = vadd.xlane.f32.xlu0 %v526_v0 }
  0xdf   : > { %v348_v1 = vpop.xlane.xlu1 %347  ;;  %v342_v2 = vpop.xlane.xlu0 %341 }
  0xe0   : > { %535 = vst.msk [vmem:[%s834_s29 + $0x10] sm:$0xff] %vm532_vm1, %v348_v1  ;;  %533 = vst.msk [vmem:[%s834_s29] sm:$0xff] %vm532_vm1, %v342_v2 }
  0xe3   : > { %v351_v3 = vpop.xlane.xlu1 %350  ;;  %v345_v4 = vpop.xlane.xlu0 %344 }
  0xe4   : > { %536 = vst.msk [vmem:[%s834_s29 + $0x18] sm:$0xff] %vm532_vm1, %v351_v3  ;;  %534 = vst.msk [vmem:[%s834_s29 + $0x8] sm:$0xff] %vm532_vm1, %v345_v4 }
  0xe7   : > { %v357_v5 = vpop.xlane.xlu1 %356  ;;  %v354_v6 = vpop.xlane.xlu0 %353 }
  0xe8   : > { %538 = vst.msk [vmem:[%s834_s29 + $0x28] sm:$0xff] %vm532_vm1, %v357_v5  ;;  %537 = vst.msk [vmem:[%s834_s29 + $0x20] sm:$0xff] %vm532_vm1, %v354_v6 }
  0xeb   : > { %v363_v7 = vpop.xlane.xlu1 %362  ;;  %v360_v8 = vpop.xlane.xlu0 %359 }
  0xec   : > { %540 = vst.msk [vmem:[%s834_s29 + $0x38] sm:$0xff] %vm532_vm1, %v363_v7  ;;  %539 = vst.msk [vmem:[%s834_s29 + $0x30] sm:$0xff] %vm532_vm1, %v360_v8 }
  0xef   : > { %v369_v9 = vpop.xlane.xlu1 %368  ;;  %v366_v10 = vpop.xlane.xlu0 %365 }
  0xf0   : > { %542 = vst.msk [vmem:[%s834_s29 + $0x48] sm:$0xff] %vm532_vm1, %v369_v9  ;;  %541 = vst.msk [vmem:[%s834_s29 + $0x40] sm:$0xff] %vm532_vm1, %v366_v10 }
  0xf3   : > { %v375_v11 = vpop.xlane.xlu1 %374  ;;  %v372_v12 = vpop.xlane.xlu0 %371 }
  0xf4   : > { %544 = vst.msk [vmem:[%s834_s29 + $0x58] sm:$0xff] %vm532_vm1, %v375_v11  ;;  %543 = vst.msk [vmem:[%s834_s29 + $0x50] sm:$0xff] %vm532_vm1, %v372_v12 }
  0xf7   : > { %v381_v13 = vpop.xlane.xlu1 %380  ;;  %v378_v14 = vpop.xlane.xlu0 %377 }
  0xf8   : > { %546 = vst.msk [vmem:[%s834_s29 + $0x68] sm:$0xff] %vm532_vm1, %v381_v13  ;;  %545 = vst.msk [vmem:[%s834_s29 + $0x60] sm:$0xff] %vm532_vm1, %v378_v14 }
  0xfb   : > { %v387_v15 = vpop.xlane.xlu1 %386  ;;  %v384_v16 = vpop.xlane.xlu0 %383 }
  0xfc   : > { %548 = vst.msk [vmem:[%s834_s29 + $0x78] sm:$0xff] %vm532_vm1, %v387_v15  ;;  %547 = vst.msk [vmem:[%s834_s29 + $0x70] sm:$0xff] %vm532_vm1, %v384_v16 }
  0xff   : > { %v393_v17 = vpop.xlane.xlu1 %392  ;;  %v390_v18 = vpop.xlane.xlu0 %389 }
 0x100   : > { %550 = vst.msk [vmem:[%s834_s29 + $0x88] sm:$0xff] %vm532_vm1, %v393_v17  ;;  %549 = vst.msk [vmem:[%s834_s29 + $0x80] sm:$0xff] %vm532_vm1, %v390_v18 }
 0x103   : > { %v399_v19 = vpop.xlane.xlu1 %398  ;;  %v396_v20 = vpop.xlane.xlu0 %395 }
 0x104   : > { %552 = vst.msk [vmem:[%s834_s29 + $0x98] sm:$0xff] %vm532_vm1, %v399_v19  ;;  %551 = vst.msk [vmem:[%s834_s29 + $0x90] sm:$0xff] %vm532_vm1, %v396_v20 }
 0x107   : > { %v405_v21 = vpop.xlane.xlu1 %404  ;;  %v402_v22 = vpop.xlane.xlu0 %401 }
 0x108   : > { %554 = vst.msk [vmem:[%s834_s29 + $0xa8] sm:$0xff] %vm532_vm1, %v405_v21  ;;  %553 = vst.msk [vmem:[%s834_s29 + $0xa0] sm:$0xff] %vm532_vm1, %v402_v22 }
 0x10b   : > { %v411_v23 = vpop.xlane.xlu1 %410  ;;  %v408_v24 = vpop.xlane.xlu0 %407 }
 0x10c   : > { %556 = vst.msk [vmem:[%s834_s29 + $0xb8] sm:$0xff] %vm532_vm1, %v411_v23  ;;  %555 = vst.msk [vmem:[%s834_s29 + $0xb0] sm:$0xff] %vm532_vm1, %v408_v24 }
 0x10f   : > { %v417_v25 = vpop.xlane.xlu1 %416  ;;  %v414_v26 = vpop.xlane.xlu0 %413 }
 0x110   : > { %558 = vst.msk [vmem:[%s834_s29 + $0xc8] sm:$0xff] %vm532_vm1, %v417_v25  ;;  %557 = vst.msk [vmem:[%s834_s29 + $0xc0] sm:$0xff] %vm532_vm1, %v414_v26 }
 0x113   : > { %v423_v27 = vpop.xlane.xlu1 %422  ;;  %v420_v28 = vpop.xlane.xlu0 %419 }
 0x114   : > { %560 = vst.msk [vmem:[%s834_s29 + $0xd8] sm:$0xff] %vm532_vm1, %v423_v27  ;;  %559 = vst.msk [vmem:[%s834_s29 + $0xd0] sm:$0xff] %vm532_vm1, %v420_v28 }
 0x117   : > { %v429_v29 = vpop.xlane.xlu1 %428  ;;  %v426_v30 = vpop.xlane.xlu0 %425 }
 0x118   : > { %562 = vst.msk [vmem:[%s834_s29 + $0xe8] sm:$0xff] %vm532_vm1, %v429_v29  ;;  %561 = vst.msk [vmem:[%s834_s29 + $0xe0] sm:$0xff] %vm532_vm1, %v426_v30 }
 0x11b   : > { %v435_v31 = vpop.xlane.xlu1 %434  ;;  %v432_v32 = vpop.xlane.xlu0 %431 }
 0x11c   : > { %564 = vst.msk [vmem:[%s834_s29 + $0xf8] sm:$0xff] %vm532_vm1, %v435_v31  ;;  %563 = vst.msk [vmem:[%s834_s29 + $0xf0] sm:$0xff] %vm532_vm1, %v432_v32 }
 0x11f   : > { %v441_v33 = vpop.xlane.xlu1 %440  ;;  %v438_v34 = vpop.xlane.xlu0 %437 }
 0x120   : > { %566 = vst.msk [vmem:[%s834_s29 + $0x108] sm:$0xff] %vm532_vm1, %v441_v33  ;;  %565 = vst.msk [vmem:[%s834_s29 + $0x100] sm:$0xff] %vm532_vm1, %v438_v34 }
 0x123   : > { %v447_v35 = vpop.xlane.xlu1 %446  ;;  %v444_v36 = vpop.xlane.xlu0 %443 }
 0x124   : > { %568 = vst.msk [vmem:[%s834_s29 + $0x118] sm:$0xff] %vm532_vm1, %v447_v35  ;;  %567 = vst.msk [vmem:[%s834_s29 + $0x110] sm:$0xff] %vm532_vm1, %v444_v36 }
 0x127   : > { %v453_v37 = vpop.xlane.xlu1 %452  ;;  %v450_v38 = vpop.xlane.xlu0 %449 }
 0x128   : > { %570 = vst.msk [vmem:[%s834_s29 + $0x128] sm:$0xff] %vm532_vm1, %v453_v37  ;;  %569 = vst.msk [vmem:[%s834_s29 + $0x120] sm:$0xff] %vm532_vm1, %v450_v38 }
 0x12b   : > { %v459_v39 = vpop.xlane.xlu1 %458  ;;  %v456_v40 = vpop.xlane.xlu0 %455 }
 0x12c   : > { %572 = vst.msk [vmem:[%s834_s29 + $0x138] sm:$0xff] %vm532_vm1, %v459_v39  ;;  %571 = vst.msk [vmem:[%s834_s29 + $0x130] sm:$0xff] %vm532_vm1, %v456_v40 }
 0x12f   : > { %v465_v41 = vpop.xlane.xlu1 %464  ;;  %v462_v42 = vpop.xlane.xlu0 %461 }
 0x130   : > { %574 = vst.msk [vmem:[%s834_s29 + $0x148] sm:$0xff] %vm532_vm1, %v465_v41  ;;  %573 = vst.msk [vmem:[%s834_s29 + $0x140] sm:$0xff] %vm532_vm1, %v462_v42 }
 0x133   : > { %v471_v43 = vpop.xlane.xlu1 %470  ;;  %v468_v44 = vpop.xlane.xlu0 %467 }
 0x134   : > { %576 = vst.msk [vmem:[%s834_s29 + $0x158] sm:$0xff] %vm532_vm1, %v471_v43  ;;  %575 = vst.msk [vmem:[%s834_s29 + $0x150] sm:$0xff] %vm532_vm1, %v468_v44 }
 0x137   : > { %v477_v45 = vpop.xlane.xlu1 %476  ;;  %v474_v46 = vpop.xlane.xlu0 %473 }
 0x138   : > { %578 = vst.msk [vmem:[%s834_s29 + $0x168] sm:$0xff] %vm532_vm1, %v477_v45  ;;  %577 = vst.msk [vmem:[%s834_s29 + $0x160] sm:$0xff] %vm532_vm1, %v474_v46 }
 0x13b   : > { %v483_v47 = vpop.xlane.xlu1 %482  ;;  %v480_v48 = vpop.xlane.xlu0 %479 }
 0x13c   : > { %580 = vst.msk [vmem:[%s834_s29 + $0x178] sm:$0xff] %vm532_vm1, %v483_v47  ;;  %579 = vst.msk [vmem:[%s834_s29 + $0x170] sm:$0xff] %vm532_vm1, %v480_v48 }
 0x13f   : > { %v489_v49 = vpop.xlane.xlu1 %488  ;;  %v486_v50 = vpop.xlane.xlu0 %485 }
 0x140   : > { %582 = vst.msk [vmem:[%s834_s29 + $0x188] sm:$0xff] %vm532_vm1, %v489_v49  ;;  %581 = vst.msk [vmem:[%s834_s29 + $0x180] sm:$0xff] %vm532_vm1, %v486_v50 }
 0x143   : > { %v495_v51 = vpop.xlane.xlu1 %494  ;;  %v492_v52 = vpop.xlane.xlu0 %491 }
 0x144   : > { %584 = vst.msk [vmem:[%s834_s29 + $0x198] sm:$0xff] %vm532_vm1, %v495_v51  ;;  %583 = vst.msk [vmem:[%s834_s29 + $0x190] sm:$0xff] %vm532_vm1, %v492_v52 }
 0x147   : > { %v501_v53 = vpop.xlane.xlu1 %500  ;;  %v498_v54 = vpop.xlane.xlu0 %497 }
 0x148   : > { %586 = vst.msk [vmem:[%s834_s29 + $0x1a8] sm:$0xff] %vm532_vm1, %v501_v53  ;;  %585 = vst.msk [vmem:[%s834_s29 + $0x1a0] sm:$0xff] %vm532_vm1, %v498_v54 }
 0x14b   : > { %v507_v55 = vpop.xlane.xlu1 %506  ;;  %v504_v56 = vpop.xlane.xlu0 %503 }
 0x14c   : > { %588 = vst.msk [vmem:[%s834_s29 + $0x1b8] sm:$0xff] %vm532_vm1, %v507_v55  ;;  %587 = vst.msk [vmem:[%s834_s29 + $0x1b0] sm:$0xff] %vm532_vm1, %v504_v56 }
 0x14f   : > { %v513_v57 = vpop.xlane.xlu1 %512  ;;  %v510_v58 = vpop.xlane.xlu0 %509 }
 0x150   : > { %590 = vst.msk [vmem:[%s834_s29 + $0x1c8] sm:$0xff] %vm532_vm1, %v513_v57  ;;  %589 = vst.msk [vmem:[%s834_s29 + $0x1c0] sm:$0xff] %vm532_vm1, %v510_v58 }
 0x153   : > { %v519_v59 = vpop.xlane.xlu1 %518  ;;  %v516_v60 = vpop.xlane.xlu0 %515 }
 0x154   : > { %592 = vst.msk [vmem:[%s834_s29 + $0x1d8] sm:$0xff] %vm532_vm1, %v519_v59  ;;  %591 = vst.msk [vmem:[%s834_s29 + $0x1d0] sm:$0xff] %vm532_vm1, %v516_v60 }
 0x157   : > { %v525_v61 = vpop.xlane.xlu1 %524  ;;  %v522_v62 = vpop.xlane.xlu0 %521 }
 0x158   : > { %594 = vst.msk [vmem:[%s834_s29 + $0x1e8] sm:$0xff] %vm532_vm1, %v525_v61  ;;  %593 = vst.msk [vmem:[%s834_s29 + $0x1e0] sm:$0xff] %vm532_vm1, %v522_v62 }
 0x15b   : > { %v531_v63 = vpop.xlane.xlu1 %530  ;;  %v528_v0 = vpop.xlane.xlu0 %527 }
 0x15c   : > { %596 = vst.msk [vmem:[%s834_s29 + $0x1f8] sm:$0xff] %vm532_vm1, %v531_v63  ;;  %595 = vst.msk [vmem:[%s834_s29 + $0x1f0] sm:$0xff] %vm532_vm1, %v528_v0 }
 0x15d PF: > { %s24_s1 = sadd.s32 1, %s779_s1  }
 0x15e   : > { %p21_p10 = scmp.ge.s32.totalorder %s24_s1, 3  }
 0x160   :  { %23 = sbr.rel (!%p21_p10) target bundleno = 26 (0x1a), region = 126 }
 0x165   :  { %619 = vsyncmov [#allocation4] }
 0x168   :  { %s620_s25 = vpop.sfrf %619 }
 0x169   :  { %p685_p11 = scmp.ne.s32.totalorder %s620_s25, 0 }
 0x16b   :  { %624 = shalt.err (%p685_p11)  }
 0x16c   :  { %626 = vsyncmov [#allocation4 + $0x1] }
 0x16f   :  { %s627_s30 = vpop.sfrf %626 }
 0x170   :  { %p686_p12 = scmp.ne.s32.totalorder %s627_s30, 0 }
 0x172   :  { %631 = shalt.err (%p686_p12)  }

</bundles_post_ra>
